<compile_context>
chip_gen: v7x
topology: tpu7x:2x2x1
jax: 0.10.0
libtpu: 0.0.40
codegen_flags: <defaults>
</compile_context>

<pallas_src>
import functools

import numpy as np
import jax
import jax.numpy as jnp
from jax.experimental import pallas as pl
from jax.experimental.pallas import tpu as pltpu


# --------------------------------------------------------------------------
# Pallas kernel: one fused sin() over a lane-dense flattened slab.
#   pos_ref : (Bt, L) float32  positions, already repeated/tiled to flat layout
#   cp_ref  : (2,  L) float32  row 0 = inv_freq coefficients, row 1 = phase
#                              (0 for the sin half, pi/2 for the cos half)
#   o_ref   : (Bt, L) float32  flattened embedding (lane-dense store)
# --------------------------------------------------------------------------
def _sinpos_flat_kernel(pos_ref, cp_ref, o_ref, *, padding_idx):
    pos = pos_ref[...]                       # (Bt, L)
    coef = cp_ref[0:1, :]                    # (1, L)
    phase = cp_ref[1:2, :]                   # (1, L)
    # cos(x) == sin(x + pi/2): one EUP push per element instead of sin+cos.
    emb = jnp.sin(pos * coef + phase)        # (Bt, L)
    # emb[padding_idx, :] = 0  <=>  zero every element whose position is the
    # padding index (non-padding tokens always have pos > padding_idx).
    o_ref[...] = jnp.where(pos == padding_idx, 0.0, emb).astype(o_ref.dtype)


def _pick_row_block(rows, lane_len, block_bytes=1 << 20):
    """Largest row block that keeps one (Bt, L) f32 buffer under ~1 MiB."""
    cap = max(1, block_bytes // (4 * lane_len))
    if rows <= cap:
        return rows
    for bt in range(min(rows, cap), 0, -1):          # prefer sublane-aligned
        if rows % bt == 0 and bt % 8 == 0:
            return bt
    for bt in range(min(rows, cap), 0, -1):
        if rows % bt == 0:
            return bt
    return 1


def _launch_flat(pos_flat, coef_phase, padding_idx):
    rows, lane_len = pos_flat.shape
    bt = _pick_row_block(rows, lane_len)
    kernel = functools.partial(_sinpos_flat_kernel,
                               padding_idx=float(padding_idx))
    return pl.pallas_call(
        kernel,
        out_shape=jax.ShapeDtypeStruct((rows, lane_len), jnp.float32),
        grid_spec=pltpu.PrefetchScalarGridSpec(
            num_scalar_prefetch=0,
            grid=(rows // bt,),
            in_specs=[pl.BlockSpec((bt, lane_len), lambda r: (r, 0)),
                      pl.BlockSpec((2, lane_len), lambda r: (0, 0))],
            out_specs=pl.BlockSpec((bt, lane_len), lambda r: (r, 0)),
        ),
        compiler_params=pltpu.CompilerParams(
            dimension_semantics=("parallel",)),
    )(pos_flat, coef_phase)


# --------------------------------------------------------------------------
# Host-side (numpy) coefficient preparation — no exp runs on-chip.
# --------------------------------------------------------------------------
def _check_dims(embedding_dim, div_half_dim):
    assert embedding_dim % 2 == 0, "embedding_dim must be even"
    half = embedding_dim // 2
    assert div_half_dim or half > 1, \
        "embedding_dim == 2 with div_half_dim=False divides by zero"
    return half


def _inv_freq(half, div_half_dim):
    denom = half if div_half_dim else (half - 1)
    scale = np.log(10000.0) / denom
    return np.exp(np.arange(half, dtype=np.float32) * np.float32(-scale))


def _coef_phase_base(half, div_half_dim):
    invf = _inv_freq(half, div_half_dim)                       # (half,)
    coef_d = np.concatenate([invf, invf])                      # (D,)
    phase_d = np.concatenate([np.zeros(half, np.float32),
                              np.full(half, np.pi / 2, np.float32)])
    return coef_d, phase_d


def _coef_phase_s_major(seq_len, half, div_half_dim):
    # flat index f = s*D + j  (row-major (S, D))
    coef_d, phase_d = _coef_phase_base(half, div_half_dim)
    return jnp.asarray(np.stack([np.tile(coef_d, seq_len),
                                 np.tile(phase_d, seq_len)]))   # (2, S*D)


def _coef_phase_d_major(seq_len, half, div_half_dim):
    # flat index f = d*S + s  (row-major (D, S) — transposed output)
    coef_d, phase_d = _coef_phase_base(half, div_half_dim)
    return jnp.asarray(np.stack([np.repeat(coef_d, seq_len),
                                 np.repeat(phase_d, seq_len)]))  # (2, D*S)


def _make_positions(tokens, padding_idx):
    mask = (tokens != padding_idx).astype(jnp.int32)
    return jnp.cumsum(mask, axis=1) * mask + padding_idx        # (B, S) int32


# --------------------------------------------------------------------------
# Wrappers (forward-pass equivalents of the nn.Module)
# --------------------------------------------------------------------------
def sinusoidal_positional_embedding(tokens, *, embedding_dim, padding_idx,
                                    div_half_dim=False):
    """2-D forward path: (B, S) int tokens -> (B, S, embedding_dim) float32."""
    assert tokens.ndim == 2, "expected (B, S) integer input"
    half = _check_dims(embedding_dim, div_half_dim)
    B, S = tokens.shape

    pos = _make_positions(tokens.astype(jnp.int32),
                          padding_idx).astype(jnp.float32)       # (B, S)
    # Flat (s-major) layout: element f = s*D + j  ->  pos repeated D times.
    pos_flat = jnp.repeat(pos, embedding_dim, axis=1)            # (B, S*D)
    cp = _coef_phase_s_major(S, half, div_half_dim)              # (2, S*D)

    out = _launch_flat(pos_flat, cp, padding_idx)                # (B, S*D)
    return out.reshape(B, S, embedding_dim)                      # free reshape


def make_grid2d(height, width, num_batches, *, embedding_dim, padding_idx,
                div_half_dim=False, center_shift=None):
    """4-D forward path helper: returns (B, 2*embedding_dim, H, W)."""
    h, w = height, width
    half = _check_dims(embedding_dim, div_half_dim)
    h_shift = 0
    w_shift = 0
    if center_shift is not None:
        h_shift = center_shift - (h // 2 if h % 2 == 0 else h // 2 + 1)
        w_shift = center_shift - (w // 2 if w % 2 == 0 else w // 2 + 1)

    # Batch-invariant work: ONE x row + ONE y row, in ONE fused launch.
    smax = max(h, w)
    tok = np.full((2, smax), padding_idx, dtype=np.int32)
    tok[0, :w] = np.arange(1, w + 1, dtype=np.int32) + w_shift
    tok[1, :h] = np.arange(1, h + 1, dtype=np.int32) + h_shift
    pos = _make_positions(jnp.asarray(tok), padding_idx).astype(jnp.float32)

    # Flat (d-major) layout: element f = d*S + s  ->  pos tiled D times, so
    # the kernel output is already transposed ((row, D, S)) — no XLA transpose.
    pos_flat = jnp.tile(pos, (1, embedding_dim))                 # (2, D*smax)
    cp = _coef_phase_d_major(smax, half, div_half_dim)           # (2, D*smax)

    out = _launch_flat(pos_flat, cp, padding_idx)                # (2, D*smax)
    emb_t = out.reshape(2, embedding_dim, smax)                  # (2, D, smax)
    x_t = emb_t[0, :, :w]                                        # (D, w)
    y_t = emb_t[1, :, :h]                                        # (D, h)

    # Batch dimension and the h/w repeats are pure broadcast (layout glue).
    x_grid = jnp.broadcast_to(x_t[None, :, None, :],
                              (num_batches, embedding_dim, h, w))
    y_grid = jnp.broadcast_to(y_t[None, :, :, None],
                              (num_batches, embedding_dim, h, w))
    return jnp.concatenate([x_grid, y_grid], axis=1)             # (B, 2D, h, w)


def make_grid2d_like(x, *, embedding_dim, padding_idx, div_half_dim=False,
                     center_shift=None):
    """x: (B, ..., H, W) -> (B, 2*embedding_dim, H, W), cast to x.dtype."""
    h, w = x.shape[-2], x.shape[-1]
    grid = make_grid2d(h, w, x.shape[0], embedding_dim=embedding_dim,
                       padding_idx=padding_idx, div_half_dim=div_half_dim,
                       center_shift=center_shift)
    # TODO(synk): on v6e/v7x a bf16 kernel output would halve writeback when
    # x.dtype is bf16; kept f32 here to match the reference exactly.
    return grid.astype(x.dtype)


# --------------------------------------------------------------------------
# Pure-JAX reference (mirrors the PyTorch table-lookup forward)
# --------------------------------------------------------------------------
def _reference_forward(tokens, embedding_dim, padding_idx, div_half_dim=False):
    b, seq_len = tokens.shape
    half = embedding_dim // 2
    c = (np.log(10000.0) / (half - 1)) if not div_half_dim \
        else (np.log(10000.0) / half)
    max_pos = padding_idx + 1 + seq_len
    inv_freq = jnp.exp(jnp.arange(half, dtype=jnp.float32) * (-c))
    tab = jnp.arange(max_pos, dtype=jnp.float32)[:, None] * inv_freq[None, :]
    tab = jnp.concatenate([jnp.sin(tab), jnp.cos(tab)], axis=1)
    tab = tab.at[padding_idx].set(0.0)
    mask = (tokens != padding_idx).astype(jnp.int32)
    positions = jnp.cumsum(mask, axis=1) * mask + padding_idx
    return tab[positions.reshape(-1)].reshape(b, seq_len, embedding_dim)


def _reference_grid2d(h, w, num_batches, embedding_dim, padding_idx):
    x_axis = jnp.tile(jnp.arange(1, w + 1, dtype=jnp.int32)[None, :],
                      (num_batches, 1))
    y_axis = jnp.tile(jnp.arange(1, h + 1, dtype=jnp.int32)[None, :],
                      (num_batches, 1))
    x_emb = _reference_forward(x_axis, embedding_dim, padding_idx)
    y_emb = _reference_forward(y_axis, embedding_dim, padding_idx)
    x_grid = jnp.broadcast_to(x_emb.transpose(0, 2, 1)[:, :, None, :],
                              (num_batches, embedding_dim, h, w))
    y_grid = jnp.broadcast_to(y_emb.transpose(0, 2, 1)[:, :, :, None],
                              (num_batches, embedding_dim, h, w))
    return jnp.concatenate([x_grid, y_grid], axis=1)


# --------------------------------------------------------------------------
if __name__ == "__main__":
    key = jax.random.PRNGKey(0)
    k_tok, k_feat = jax.random.split(key)

    B, S, D = 2, 8, 32
    padding_idx = 0

    # Integer tokens; value 0 == padding_idx so the padding path is exercised.
    tokens = jax.random.randint(k_tok, (B, S), 0, 5, dtype=jnp.int32)

    # --- 2-D forward path -------------------------------------------------
    out = sinusoidal_positional_embedding(
        tokens, embedding_dim=D, padding_idx=padding_idx)
    out = jax.block_until_ready(out)
    ref = jax.block_until_ready(_reference_forward(tokens, D, padding_idx))
    assert out.shape == (B, S, D), out.shape
    np.testing.assert_allclose(np.asarray(out), np.asarray(ref),
                               rtol=1e-5, atol=2e-5)

    # --- 4-D forward path (make_grid2d_like) ------------------------------
    H = W = 16
    feat = jax.random.normal(k_feat, (B, 4, H, W), dtype=jnp.float32)
    grid = make_grid2d_like(feat, embedding_dim=D, padding_idx=padding_idx)
    grid = jax.block_until_ready(grid)
    grid_ref = jax.block_until_ready(
        _reference_grid2d(H, W, B, D, padding_idx))
    assert grid.shape == (B, 2 * D, H, W), grid.shape
    np.testing.assert_allclose(np.asarray(grid), np.asarray(grid_ref),
                               rtol=1e-5, atol=2e-5)

    print("KERNEL_OK")
</pallas_src>

<mosaic_0001>
module attributes {stable_mosaic.version = 11 : i64} {
  func.func @_sinpos_flat_kernel(%arg0: i32, %arg1: memref<2x256xf32, #tpu.memory_space<vmem>>, %arg2: memref<2x256xf32, #tpu.memory_space<vmem>>, %arg3: memref<2x256xf32, #tpu.memory_space<vmem>>) attributes {dimension_semantics = [#tpu.dimension_semantics<parallel>], iteration_bounds = array<i64: 1>, scalar_prefetch = 0 : i64, scratch_operands = 0 : i64, tpu.core_type = #tpu.core_type<tc>, window_params = [{transform_indices = @transform_0, window_bounds = array<i64: 2, 256>}, {pipeline_mode = #tpu.pipeline_mode<synchronous>, transform_indices = @transform_1, window_bounds = array<i64: 2, 256>}, {transform_indices = @transform_2, window_bounds = array<i64: 2, 256>}]} {
    %c0 = arith.constant 0 : index
    %c0_0 = arith.constant 0 : index
    %0 = vector.load %arg1[%c0, %c0_0] : memref<2x256xf32, #tpu.memory_space<vmem>>, vector<2x256xf32>
    %c0_1 = arith.constant 0 : index
    %c0_2 = arith.constant 0 : index
    %1 = vector.load %arg2[%c0_1, %c0_2] : memref<2x256xf32, #tpu.memory_space<vmem>>, vector<1x256xf32>
    %c1 = arith.constant 1 : index
    %c0_3 = arith.constant 0 : index
    %2 = vector.load %arg2[%c1, %c0_3] : memref<2x256xf32, #tpu.memory_space<vmem>>, vector<1x256xf32>
    %3 = vector.broadcast %1 : vector<1x256xf32> to vector<2x256xf32>
    %4 = arith.mulf %0, %3 : vector<2x256xf32>
    %5 = vector.broadcast %2 : vector<1x256xf32> to vector<2x256xf32>
    %6 = arith.addf %4, %5 : vector<2x256xf32>
    %7 = math.sin %6 : vector<2x256xf32>
    %cst = arith.constant 0.000000e+00 : f32
    %8 = vector.broadcast %cst : f32 to vector<2x256xf32>
    %9 = arith.cmpf oeq, %0, %8 : vector<2x256xf32>
    %cst_4 = arith.constant 0.000000e+00 : f32
    %10 = vector.broadcast %cst_4 : f32 to vector<2x256xf32>
    %11 = arith.select %9, %10, %7 : vector<2x256xi1>, vector<2x256xf32>
    %c0_5 = arith.constant 0 : index
    %c0_6 = arith.constant 0 : index
    %12 = vector.load %arg3[%c0_5, %c0_6] : memref<2x256xf32, #tpu.memory_space<vmem>>, vector<2x256xf32>
    tpu.vector_store %arg3[%c0_5, %c0_6], %11 {strides = array<i32>} : memref<2x256xf32, #tpu.memory_space<vmem>>, vector<2x256xf32>,
    return
  }
  func.func @transform_0(%arg0: i32) -> (i32, i32) {
    %c0_i32 = arith.constant 0 : i32
    %c0_i32_0 = arith.constant 0 : i32
    return %arg0, %c0_i32 : i32, i32
  }
  func.func @transform_1(%arg0: i32) -> (i32, i32) {
    %c0_i32 = arith.constant 0 : i32
    %c0_i32_0 = arith.constant 0 : i32
    %c0_i32_1 = arith.constant 0 : i32
    return %c0_i32, %c0_i32_0 : i32, i32
  }
  func.func @transform_2(%arg0: i32) -> (i32, i32) {
    %c0_i32 = arith.constant 0 : i32
    %c0_i32_0 = arith.constant 0 : i32
    return %arg0, %c0_i32 : i32, i32
  }
}

</mosaic_0001>

<bundles_post_ra>
// kernel: tpu_custom_call.1
= control target key start
LH: loop header
LB: loop body
LE: loop exit
PB: predicated region body
PF: predicated region fallthrough
CT: control target
= control target key end

     0   :  { %7 = vsyncpa [#allocation3], 0  ;;  %s381_s0 = inlined_call_operand.hbm [shape: f32[2,256], index: 0, kind: input, shape index: {}]   ;;  %s382_s1 = inlined_call_operand.hbm [shape: f32[2,256], index: 1, kind: input, shape index: {}]   ;;  %s383_s2 = inlined_call_operand.hbm [shape: f32[2,256], index: 2, kind: output, shape index: {}]  }
   0x1   :  { %8 = vsyncpa [#allocation6], 0 }
   0x2   :  { %9 = vsyncpa [#allocation4], 0  ;;  %s295_s9 = smov [#allocation2]   ;;  %s296_s11 = smov [#allocation5]  }
   0x3   :  { %s16_s10 = sshll.u32 %s295_s9, 4  ;;  %s26_s12 = sshll.u32 %s296_s11, 4  ;;  %s17_s10 = int_to_ptr.vmem [resolvable:$true] %s16_s10  ;;  %s27_s12 = int_to_ptr.vmem [resolvable:$true] %s26_s12 }
   0x4   :  { %s223_s15 = scalar_lea.hbm %s381_s0, 64 }
   0x5   :  { %p224_p0 = scmp.ne.s32.totalorder %s381_s0, %s223_s15  ;;  %p227_p1 = scmp.lt.u32.totalorder %s223_s15, %s381_s0 }
   0x7   :  { %p229_p2 = pnand %p227_p1, %p224_p0 }
   0x9   :  { %232 = shalt.err (!%p229_p2)
}
   0xa   :  { %s233_s20 = scalar_lea.vmem %s17_s10, 64  ;;  %p238_p4 = scmp.lt.s32.totalorder %s17_s10, %s17_s10 }
   0xb   :  { %p234_p3 = scmp.ne.s32.totalorder %s17_s10, %s233_s20  ;;  %p239_p5 = scmp.lt.s32.totalorder %s233_s20, %s233_s20 }
   0xd   :  { %p240_p6 = por %p239_p5, %p238_p4 }
   0xf   :  { %p241_p7 = pnand %p240_p6, %p234_p3 }
  0x11   :  { %244 = shalt.err (!%p241_p7)
}
  0x12   :  { %19 = dma.hbm_to_vmem [thread:$0]  %s381_s0, 64, %s17_s10, [#allocation3]  }
  0x13   :  { %s245_s25 = scalar_lea.hbm %s382_s1, 64 }
  0x14   :  { %p246_p8 = scmp.ne.s32.totalorder %s382_s1, %s245_s25  ;;  %p249_p9 = scmp.lt.u32.totalorder %s245_s25, %s382_s1 }
  0x16   :  { %p251_p10 = pnand %p249_p9, %p246_p8 }
  0x18   :  { %254 = shalt.err (!%p251_p10)
}
  0x19   :  { %s255_s30 = scalar_lea.vmem %s27_s12, 64  ;;  %p260_p12 = scmp.lt.s32.totalorder %s27_s12, %s27_s12 }
  0x1a   :  { %p256_p11 = scmp.ne.s32.totalorder %s27_s12, %s255_s30  ;;  %p261_p13 = scmp.lt.s32.totalorder %s255_s30, %s255_s30 }
  0x1c   :  { %p262_p0 = por %p261_p13, %p260_p12 }
  0x1e   :  { %p263_p1 = pnand %p262_p0, %p256_p11 }
  0x20   :  { %266 = shalt.err (!%p263_p1)
}
  0x21   :  { %29 = dma.hbm_to_vmem [thread:$0]  %s382_s1, 64, %s27_s12, [#allocation6]  }
  0x22   :  { %289 = dma.done.wait [#allocation3], 64  }
  0x23   :  { %290 = vsyncadd [#allocation3], 4294967232 }
  0x24   :  { %291 = dma.done.wait [#allocation6], 64  }
  0x25   :  { %292 = vsyncadd [#allocation6], 4294967232  ;;  %v41_v0 = vlaneseq  ;;  %v297_v1 = vmov 1983009808   ;;  %v344_v15 = vld [vmem:[#allocation2] sm:$0xf] }
  0x26   :  { %v51_v2 = vunpack.c.l.s4 %v297_v1  ;;  %v37_v7 = vld [vmem:[#allocation5] ss:$2 sm:$0x3]  ;;  %v39_v8 = vld [vmem:[#allocation5 + $0x1] ss:$2 sm:$0x3] }
  0x27   :  { %v42_v3 = vshrl.u32 %v41_v0, 7  ;;  %v298_v32 = vmov 683565275   ;;  %v299_v34 = vmov 2475754826   ;;  %s304_s1 = smov [#allocation7]  }
  0x28   :  { %v52_v6 = vunpack.c.0.s8 %v51_v2  ;;  %v300_v36 = vmov 2131351028   ;;  %v301_v38 = vmov 2102212464   ;;  %v302_v40 = vmov 920167782  }
  0x29   :  { %v43_v4 = vsub.s32 0, %v42_v3  ;;  %v47_v5 = vsub.s32 1, %v42_v3  ;;  %v303_v47 = vmov 1326507024   ;;  %s191_s4 = sshll.u32 %s304_s1, 4  ;;  %vm182_vm13 = vcmp.eq.f32.partialorder %v344_v15, 0.0  ;;  %s192_s4 = int_to_ptr.vmem [resolvable:$true] %s191_s4 }
  0x2a   :  { %v55_v11 = vsub.s32 %v52_v6, %v42_v3  ;;  %s267_s5 = scalar_lea.vmem %s192_s4, 64  ;;  %p272_p3 = scmp.lt.s32.totalorder %s192_s4, %s192_s4 }
  0x2b   :  { %v44_v9 = vrot.slane %v37_v7, %v43_v4  ;;  %v48_v10 = vrot.slane %v37_v7, %v47_v5  ;;  %v63_v12 = vrot.slane %v39_v8, %v43_v4  ;;  %v67_v13 = vrot.slane %v39_v8, %v47_v5  ;;  %p268_p2 = scmp.ne.s32.totalorder %s192_s4, %s267_s5  ;;  %p273_p4 = scmp.lt.s32.totalorder %s267_s5, %s267_s5 }
  0x2d   :  { %v49_v14 = vcombine.low %v44_v9, %v48_v10  ;;  %v68_v16 = vcombine.low %v63_v12, %v67_v13  ;;  %p274_p5 = por %p273_p4, %p272_p3 }
  0x2f   :  { %v56_v17 = vrot.slane %v49_v14, %v55_v11  ;;  %v75_v18 = vrot.slane %v68_v16, %v55_v11  ;;  %p275_p6 = pnand %p274_p5, %p268_p2 }
  0x31   :  { %v58_v19 = vmul.f32 %v56_v17, %v344_v15 }
  0x33   :  { %v347_v20 = vadd.f32 %v75_v18, %v58_v19 }
  0x35   :  { %v81_v21 = vand.u32 2139095040, %v347_v20  ;;  %v78_v23 = vand.u32 2147483647, %v347_v20  ;;  %vm80_vm7 = vcmp.lt.s32.totalorder %v347_v20, 0  ;;  %vm170_vm12 = vweird.f32 %v347_v20 }
  0x37   :  { %v82_v22 = vshrl.u32 %v81_v21, 23  ;;  %v85_v26 = vand.u32 8388607, %v78_v23  ;;  %vm79_vm8 = vcmp.le.f32.partialorder %v78_v23, 0.7853982 }
  0x39   :  { %v201_v24 = vadd.s32 4294967169, %v82_v22  ;;  %v86_v29 = vor.u32 8388608, %v85_v26 }
  0x3b   :  { %v88_v25 = vadd.s32 1, %v201_v24  ;;  %v126_v49 = vshll.u32 %v86_v29, 8 }
  0x3d   :  { %vm89_vm0 = vcmp.gt.s32.totalorder %v88_v25, 0 }
  0x3e   :  { %v90_v27 = vsel %vm89_vm0, %v88_v25, 0 }
  0x3f   :  { %v92_v28 = vand.u32 31, %v90_v27  ;;  %v91_v30 = vshrl.u32 %v90_v27, 5 }
  0x41   :  { %v93_v31 = vsub.s32 32, %v92_v28  ;;  %v95_v33 = vshll.u32 %v298_v32, %v92_v28  ;;  %v98_v35 = vshll.u32 %v299_v34, %v92_v28  ;;  %v101_v37 = vshll.u32 %v300_v36, %v92_v28 }
  0x42   :  { %v104_v39 = vshll.u32 %v301_v38, %v92_v28  ;;  %v107_v41 = vshll.u32 %v302_v40, %v92_v28  ;;  %vm110_vm1 = vcmp.lt.s32.totalorder %v91_v30, 1  ;;  %vm113_vm2 = vcmp.lt.s32.totalorder %v91_v30, 4 }
  0x43   :  { %v94_v42 = vshrl.u32 %v298_v32, %v93_v31  ;;  %v96_v43 = vshrl.u32 %v299_v34, %v93_v31  ;;  %v99_v44 = vshrl.u32 %v300_v36, %v93_v31  ;;  %v102_v45 = vshrl.u32 %v301_v38, %v93_v31 }
  0x44   :  { %v105_v46 = vshrl.u32 %v302_v40, %v93_v31  ;;  %v108_v48 = vshrl.u32 %v303_v47, %v93_v31  ;;  %vm111_vm3 = vcmp.lt.s32.totalorder %v91_v30, 2  ;;  %vm112_vm4 = vcmp.lt.s32.totalorder %v91_v30, 3 }
  0x45   :  { %v97_v50 = vor.u32 %v96_v43, %v95_v33  ;;  %v100_v51 = vor.u32 %v99_v44, %v98_v35  ;;  %v103_v52 = vor.u32 %v102_v45, %v101_v37 }
  0x46   :  { %v106_v53 = vor.u32 %v105_v46, %v104_v39  ;;  %v109_v54 = vor.u32 %v108_v48, %v107_v41 }
  0x47   :  { %v114_v55 = vsel %vm110_vm1, %v94_v42, %v97_v50  ;;  %v115_v56 = vsel %vm113_vm2, %v103_v52, 2102212464  ;;  %v118_v57 = vsel %vm110_vm1, %v97_v50, %v100_v51  ;;  %v122_v58 = vsel %vm110_vm1, %v100_v51, %v103_v52 }
  0x48   :  { %v116_v59 = vsel %vm112_vm4, %v100_v51, %v115_v56  ;;  %v119_v60 = vsel %vm113_vm2, %v106_v53, 920167782  ;;  %v123_v61 = vsel %vm113_vm2, %v109_v54, 1326507024 }
  0x49   :  { %v120_v62 = vsel %vm112_vm4, %v103_v52, %v119_v60  ;;  %v124_v63 = vsel %vm112_vm4, %v106_v53, %v123_v61  ;;  %v117_v0 = vsel %vm111_vm3, %v114_v55, %v116_v59 }
  0x4a   :  { %v121_v1 = vsel %vm111_vm3, %v118_v57, %v120_v62  ;;  %v125_v2 = vsel %vm111_vm3, %v122_v58, %v124_v63  ;;  %v133_v7 = vmul.u32 %v126_v49, %v117_v0 }
  0x4b   :  { %v353_v3 = vmul.u32.u64.low %v126_v49, %v125_v2  ;;  %v354_v4 = vmul.u32.u64.high %v126_v49, %v125_v2, %v353_v3  ;;  %v356_v5 = vmul.u32.u64.low %v126_v49, %v121_v1  ;;  %v357_v6 = vmul.u32.u64.high %v126_v49, %v121_v1, %v356_v5 }
  0x4d   :  { %vm135_vm5 = vc.u32 %v354_v4, %v356_v5  ;;  %v136_v8 = vadd.s32 1, %v357_v6  ;;  %v134_v21 = vadd.s32 %v356_v5, %v354_v4 }
  0x4f   :  { %v137_v9 = vsel %vm135_vm5, %v136_v8, %v357_v6 }
  0x50   :  { %v138_v10 = vadd.s32 %v137_v9, %v133_v7 }
  0x52   :  { %v139_v11 = vadd.s32 536870912, %v138_v10 }
  0x54   :  { %v140_v12 = vshrl.u32 %v139_v11, 30 }
  0x56   :  { %v141_v13 = vshll.u32 %v140_v12, 30  ;;  %v164_v34 = vsub.s32 4, %v140_v12 }
  0x58   :  { %v142_v14 = vsub.s32 %v138_v10, %v141_v13  ;;  %v165_v37 = vsel %vm80_vm7, %v164_v34, %v140_v12 }
  0x59   :  { %v167_v40 = vsel %vm79_vm8, 0, %v165_v37 }
  0x5a   :  { %v144_v16 = vsub.s32 0, %v142_v14  ;;  %v171_v41 = vadd.s32 3, %v167_v40 }
  0x5c   :  { %v202_v17 = vmin.u32 %v144_v16, %v142_v14  ;;  %v172_v42 = vand.u32 3, %v171_v41 }
  0x5e   :  { %v146_v18 = vclz %v202_v17  ;;  %vm177_vm9 = vcmp.eq.s32.totalorder %v172_v42, 2  ;;  %vm174_vm10 = vcmp.eq.s32.totalorder %v172_v42, 0  ;;  %vm173_vm11 = vcmp.lt.s32.totalorder %v172_v42, 2 }
  0x60   :  { %v203_v19 = vadd.s32 4294967294, %v146_v18 }
  0x62   :  { %vm204_vm6 = vcmp.lt.s32.totalorder %v203_v19, 0 }
  0x63   :  { %v149_v22 = vsel %vm204_vm6, 0, %v203_v19 }
  0x64   :  { %v150_v24 = vsub.s32 32, %v149_v22  ;;  %v151_v25 = vshll.u32 %v142_v14, %v149_v22  ;;  %v154_v26 = vsub.s32 4294967266, %v149_v22 }
  0x66   :  { %v152_v27 = vshrl.u32 %v134_v21, %v150_v24  ;;  %v155_v28 = vadd.s32 127, %v154_v26 }
  0x68   :  { %v153_v29 = vor.u32 %v152_v27, %v151_v25  ;;  %v156_v30 = vshll.u32 %v155_v28, 23 }
  0x6a   :  { %v157_v31 = vor.u32 4788187, %v156_v30  ;;  %v160_v32 = vcvt.s32.f32 %v153_v29 }
  0x6c   :  { %v158_v33 = vand.u32 2147483647, %v157_v31 }
  0x6e   :  { %v161_v35 = vmul.f32 %v160_v32, %v158_v33 }
  0x70   :  { %v162_v36 = vxor.u32 2147483648, %v161_v35 }
  0x72   :  { %v163_v38 = vsel %vm80_vm7, %v162_v36, %v161_v35 }
  0x73   :  { %v166_v39 = vsel %vm79_vm8, %v347_v20, %v163_v38 }
  0x74   :  { %219 = vcosq.f32 %v166_v39 }
  0x75   :  { %221 = vsinq.f32 %v166_v39 }
  0x7e   :  { %v220_v43 = vpop.eup %219 }
  0x7f   :  { %v222_v44 = vpop.eup %221  ;;  %v178_v45 = vxor.u32 2147483648, %v220_v43 }
  0x80   :  { %v175_v46 = vxor.u32 2147483648, %v222_v44 }
  0x81   :  { %v179_v23 = vsel %vm177_vm9, %v178_v45, %v222_v44 }
  0x82   :  { %v176_v47 = vsel %vm174_vm10, %v220_v43, %v175_v46 }
  0x83   :  { %v180_v48 = vsel %vm173_vm11, %v176_v47, %v179_v23 }
  0x84   :  { %v181_v49 = vsel %vm170_vm12, nan, %v180_v48 }
  0x85   :  { %v183_v50 = vsel %vm182_vm13, 0.0, %v181_v49 }
  0x86   :  { %184 = vst [vmem:[#allocation7] sm:$0xf] %v183_v50 }
  0x87   :  { %278 = shalt.err (!%p275_p6)
}
  0x88   :  { %s279_s8 = scalar_lea.hbm %s383_s2, 64 }
  0x89   :  { %p280_p7 = scmp.ne.s32.totalorder %s383_s2, %s279_s8  ;;  %p283_p8 = scmp.lt.u32.totalorder %s279_s8, %s383_s2 }
  0x8b   :  { %p285_p9 = pnand %p283_p8, %p280_p7 }
  0x8d   :  { %288 = shalt.err (!%p285_p9)
}
  0x8e   :  { %194 = dma.vmem_to_hbm [thread:$0]  %s192_s4, 64, %s383_s2, [#allocation4]  }
  0x8f   :  { %293 = dma.done.wait [#allocation4], 64  }
  0x90   :  { %294 = vsyncadd [#allocation4], 4294967232 }
  0x91   :  { %198 = vsyncpa [#allocation3], 1 }
  0x92   :  { %199 = vsyncpa [#allocation6], 1 }
  0x93   :  { %200 = vsyncpa [#allocation4], 1 }

</bundles_post_ra>
